<compile_context>
chip_gen: v5e
topology: v5e:2x2
jax: 0.10.0
libtpu: 0.0.40
codegen_flags: <defaults>
</compile_context>

<pallas_src>
import functools

import jax
import jax.numpy as jnp
import numpy as np
from jax import lax
from jax.experimental import pallas as pl
from jax.experimental.pallas import tpu as pltpu


def _mha_kernel(q_ref, k_ref, v_ref, m_ref,
                wq_ref, bq_ref, wkv_ref, bkv_ref,
                wf_ref, bf_ref, g_ref, be_ref,
                o_ref,
                *, num_heads, d_in, inv_temp, ln_eps):
    b_blk, Lq, q_dim = q_ref.shape
    _, Lk, k_dim = k_ref.shape
    hd = num_heads * d_in

    # Flatten the batch block to 2-D rows so each projection is one tall MXU
    # matmul (M = Bblk*L).  Collapsing leading dims keeps the (8,128) tiling
    # of the last two axes intact, so this reshape is a layout no-op.
    xq = q_ref[...].reshape(b_blk * Lq, q_dim)
    xk = k_ref[...].reshape(b_blk * Lk, k_dim)
    xv = v_ref[...].reshape(b_blk * Lk, k_dim)
    # K and V share the same input rows; keep the residency of xv only to
    # preserve identical semantics if k != v (they are the same matmul input
    # in this module's forward when k is v, but the module allows k != v).
    # K projection consumes xk, V projection consumes xv -> do them fused
    # only when the inputs alias; here the module always passes k and v
    # separately, so fuse on the weight axis instead (same input feature dim).

    # Q projection; 1/temperature folded into Q once.
    Q = (jnp.dot(xq, wq_ref[...], preferred_element_type=jnp.float32)
         + bq_ref[...]) * jnp.float32(inv_temp)
    Q = Q.reshape(b_blk, Lq, hd)

    # Fused K|V projection: wkv is (k_dim, 2*hd) so this is one lane-full
    # matmul.  K heads live in lanes [0, hd), V heads in [hd, 2*hd).
    K = jnp.dot(xk, wkv_ref[:, :hd], preferred_element_type=jnp.float32) \
        + bkv_ref[:, :hd]
    V = jnp.dot(xv, wkv_ref[:, hd:], preferred_element_type=jnp.float32) \
        + bkv_ref[:, hd:]
    K = K.reshape(b_blk, Lk, hd)
    V = V.reshape(b_blk, Lk, hd)

    # Mask (0/1 float, 1 = masked) -> additive bias, computed once and shared
    # by all heads.  A large finite negative avoids inf-inf = NaN on fully
    # masked rows while still underflowing to exactly 0 after exp().
    bias = m_ref[...] * jnp.float32(-1e30)

    # Residual + output-projection bias; per-head contributions accumulate in,
    # so no lane-axis concatenate of head outputs is needed.
    y = xq + bf_ref[...]

    for h in range(num_heads):                     # static unroll (H is small)
        s = h * d_in
        qh = Q[:, :, s:s + d_in]                   # (Bblk, Lq, d_in)
        kh = K[:, :, s:s + d_in]                   # (Bblk, Lk, d_in)
        vh = V[:, :, s:s + d_in]                   # (Bblk, Lk, d_in)

        # Batched over Bblk; contracts the last axes directly (no kh.T).
        logits = jnp.einsum('bqd,bkd->bqk', qh, kh,
                            preferred_element_type=jnp.float32) + bias

        m = jnp.max(logits, axis=-1, keepdims=True)
        e = jnp.exp(logits - m)
        denom = jnp.sum(e, axis=-1, keepdims=True)
        p = e * pl.reciprocal(denom, approx=False)

        ctx = jnp.einsum('bqk,bkd->bqd', p, vh,
                         preferred_element_type=jnp.float32)
        ctx2d = ctx.reshape(b_blk * Lq, d_in)

        # y += ctx_h @ Wf_h  (per-head sublane slice of the output projection).
        y = y + jnp.dot(ctx2d, wf_ref[s:s + d_in, :],
                        preferred_element_type=jnp.float32)

    # TODO(synk): Dropout(p=0.1) is identity here (eval semantics); training
    # parity would need a pltpu.prng_seed / prng_random_bits mask.

    # LayerNorm over the feature axis.
    mean = jnp.mean(y, axis=-1, keepdims=True)
    var = jnp.mean(jnp.square(y - mean), axis=-1, keepdims=True)
    y = (y - mean) * lax.rsqrt(var + jnp.float32(ln_eps))
    y = y * g_ref[...] + be_ref[...]

    o_ref[...] = y.reshape(b_blk, Lq, q_dim)


def multi_head_attention(q, k, v, mask, params, *, num_heads, d_in, k_dim,
                         batch_block=None):
    """q: (B, Lq, q_dim)  k, v: (B, Lk, k_dim)  mask: (B, Lq, Lk) float32 (1=masked)."""
    B, Lq, q_dim = q.shape
    _, Lk, _ = k.shape
    hd = num_heads * d_in
    inv_temp = float(1.0 / np.power(k_dim, 0.5))

    # Batch-block: several batch elements per grid step so the flattened
    # projection matmuls see M = Bblk*Lq rows, while staying well inside the
    # scoped-VMEM default at these feature widths.
    if batch_block is None:
        batch_block = min(B, 16)
    n_blocks = int(np.ceil(B / batch_block))
    Bp = n_blocks * batch_block
    if Bp != B:
        pad = Bp - B
        q = jnp.pad(q, ((0, pad), (0, 0), (0, 0)))
        k = jnp.pad(k, ((0, pad), (0, 0), (0, 0)))
        v = jnp.pad(v, ((0, pad), (0, 0), (0, 0)))
        mask = jnp.pad(mask, ((0, pad), (0, 0), (0, 0)))

    # Fuse the K and V projection weights/biases on the output axis so the
    # kernel sees one (k_dim, 2*hd) weight (lane-full when hd == 64).
    wkv = jnp.concatenate([params["wk"], params["wv"]], axis=1)
    bkv = jnp.concatenate([params["bk"], params["bv"]], axis=1)

    kernel = functools.partial(
        _mha_kernel, num_heads=num_heads, d_in=d_in,
        inv_temp=inv_temp, ln_eps=1e-5)

    full2d = lambda shape: pl.BlockSpec(shape, lambda b: (0, 0))

    out = pl.pallas_call(
        kernel,
        out_shape=jax.ShapeDtypeStruct((Bp, Lq, q_dim), jnp.float32),
        grid_spec=pltpu.PrefetchScalarGridSpec(
            num_scalar_prefetch=0,
            grid=(n_blocks,),
            in_specs=[
                pl.BlockSpec((batch_block, Lq, q_dim), lambda b: (b, 0, 0)),  # q
                pl.BlockSpec((batch_block, Lk, k_dim), lambda b: (b, 0, 0)),  # k
                pl.BlockSpec((batch_block, Lk, k_dim), lambda b: (b, 0, 0)),  # v
                pl.BlockSpec((batch_block, Lq, Lk), lambda b: (b, 0, 0)),     # mask
                full2d((q_dim, hd)), full2d((1, hd)),                         # wq, bq
                full2d((k_dim, 2 * hd)), full2d((1, 2 * hd)),                 # wkv, bkv
                full2d((hd, q_dim)), full2d((1, q_dim)),                      # wf, bf
                full2d((1, q_dim)), full2d((1, q_dim)),                       # gamma, beta
            ],
            out_specs=pl.BlockSpec((batch_block, Lq, q_dim),
                                   lambda b: (b, 0, 0)),
        ),
        compiler_params=pltpu.CompilerParams(
            dimension_semantics=("parallel",)),
    )(q, k, v, mask,
      params["wq"], params["bq"], wkv, bkv,
      params["wf"], params["bf"], params["gamma"], params["beta"])
    return out[:B]


def _reference(q, k, v, mask, params, *, num_heads, d_in, k_dim):
    """Pure-JAX reference mirroring the PyTorch forward (eval mode)."""
    B, Lq, q_dim = q.shape
    temp = np.power(k_dim, 0.5)
    Q = q @ params["wq"] + params["bq"]
    K = k @ params["wk"] + params["bk"]
    V = v @ params["wv"] + params["bv"]
    Q = Q.reshape(B, Lq, num_heads, d_in)
    K = K.reshape(B, -1, num_heads, d_in)
    V = V.reshape(B, -1, num_heads, d_in)
    attn = jnp.einsum("bqhd,bkhd->bhqk", Q, K) / temp
    attn = jnp.where(mask[:, None, :, :] > 0.5, -jnp.inf, attn)
    attn = jax.nn.softmax(attn, axis=-1)
    O = jnp.einsum("bhqk,bkhd->bqhd", attn, V).reshape(B, Lq, num_heads * d_in)
    y = O @ params["wf"] + params["bf"] + q
    mean = jnp.mean(y, axis=-1, keepdims=True)
    var = jnp.mean((y - mean) ** 2, axis=-1, keepdims=True)
    y = (y - mean) / jnp.sqrt(var + 1e-5)
    return y * params["gamma"] + params["beta"]


if __name__ == "__main__":
    # Small shapes consistent with the module.
    B, Lq, Lk = 2, 8, 8
    q_dim, k_dim, d_in, num_heads = 32, 16, 16, 4
    hd = num_heads * d_in

    key = jax.random.PRNGKey(0)
    keys = jax.random.split(key, 12)

    # Deterministic parameter init mimicking the PyTorch module's __init__.
    std_q = np.sqrt(2.0 / (q_dim + d_in))
    std_k = np.sqrt(2.0 / (k_dim + d_in))
    std_f = np.sqrt(2.0 / (hd + q_dim))          # xavier_normal
    params = {
        "wq": std_q * jax.random.normal(keys[0], (q_dim, hd), jnp.float32),
        "wk": std_k * jax.random.normal(keys[1], (k_dim, hd), jnp.float32),
        "wv": std_k * jax.random.normal(keys[2], (k_dim, hd), jnp.float32),
        "wf": std_f * jax.random.normal(keys[3], (hd, q_dim), jnp.float32),
        "bq": jax.random.uniform(keys[4], (1, hd), jnp.float32,
                                 -1 / np.sqrt(q_dim), 1 / np.sqrt(q_dim)),
        "bk": jax.random.uniform(keys[5], (1, hd), jnp.float32,
                                 -1 / np.sqrt(k_dim), 1 / np.sqrt(k_dim)),
        "bv": jax.random.uniform(keys[6], (1, hd), jnp.float32,
                                 -1 / np.sqrt(k_dim), 1 / np.sqrt(k_dim)),
        "bf": jax.random.uniform(keys[7], (1, q_dim), jnp.float32,
                                 -1 / np.sqrt(hd), 1 / np.sqrt(hd)),
        "gamma": jnp.ones((1, q_dim), jnp.float32),
        "beta": jnp.zeros((1, q_dim), jnp.float32),
    }

    q = jax.random.normal(keys[8], (B, Lq, q_dim), jnp.float32)
    k = jax.random.normal(keys[9], (B, Lk, k_dim), jnp.float32)
    v = jax.random.normal(keys[10], (B, Lk, k_dim), jnp.float32)
    # Boolean mask (1.0 = masked); keep at least one unmasked key per query row.
    mask = (jax.random.uniform(keys[11], (B, Lq, Lk)) < 0.3).astype(jnp.float32)
    mask = mask.at[:, :, 0].set(0.0)

    out = multi_head_attention(q, k, v, mask, params,
                               num_heads=num_heads, d_in=d_in, k_dim=k_dim)
    out = jax.block_until_ready(out)

    ref = _reference(q, k, v, mask, params,
                     num_heads=num_heads, d_in=d_in, k_dim=k_dim)
    # Slightly relaxed vs 1e-5: benign fp reordering (Q pre-scaling, fused KV
    # projection, per-head accumulation of the output projection,
    # reciprocal-multiply softmax).
    np.testing.assert_allclose(np.asarray(out), np.asarray(ref),
                               rtol=5e-5, atol=5e-5)
    print("KERNEL_OK")
</pallas_src>

<mosaic_0001>
module attributes {stable_mosaic.version = 11 : i64} {
  func.func @_mha_kernel(%arg0: i32, %arg1: memref<2x8x32xf32, #tpu.memory_space<vmem>>, %arg2: memref<2x8x16xf32, #tpu.memory_space<vmem>>, %arg3: memref<2x8x16xf32, #tpu.memory_space<vmem>>, %arg4: memref<2x8x8xf32, #tpu.memory_space<vmem>>, %arg5: memref<32x64xf32, #tpu.memory_space<vmem>>, %arg6: memref<1x64xf32, #tpu.memory_space<vmem>>, %arg7: memref<16x128xf32, #tpu.memory_space<vmem>>, %arg8: memref<1x128xf32, #tpu.memory_space<vmem>>, %arg9: memref<64x32xf32, #tpu.memory_space<vmem>>, %arg10: memref<1x32xf32, #tpu.memory_space<vmem>>, %arg11: memref<1x32xf32, #tpu.memory_space<vmem>>, %arg12: memref<1x32xf32, #tpu.memory_space<vmem>>, %arg13: memref<2x8x32xf32, #tpu.memory_space<vmem>>) attributes {dimension_semantics = [#tpu.dimension_semantics<parallel>], iteration_bounds = array<i64: 1>, scalar_prefetch = 0 : i64, scratch_operands = 0 : i64, tpu.core_type = #tpu.core_type<tc>, window_params = [{transform_indices = @transform_0, window_bounds = array<i64: 2, 8, 32>}, {transform_indices = @transform_1, window_bounds = array<i64: 2, 8, 16>}, {transform_indices = @transform_2, window_bounds = array<i64: 2, 8, 16>}, {transform_indices = @transform_3, window_bounds = array<i64: 2, 8, 8>}, {pipeline_mode = #tpu.pipeline_mode<synchronous>, transform_indices = @transform_4, window_bounds = array<i64: 32, 64>}, {pipeline_mode = #tpu.pipeline_mode<synchronous>, transform_indices = @transform_5, window_bounds = array<i64: 1, 64>}, {pipeline_mode = #tpu.pipeline_mode<synchronous>, transform_indices = @transform_6, window_bounds = array<i64: 16, 128>}, {pipeline_mode = #tpu.pipeline_mode<synchronous>, transform_indices = @transform_7, window_bounds = array<i64: 1, 128>}, {pipeline_mode = #tpu.pipeline_mode<synchronous>, transform_indices = @transform_8, window_bounds = array<i64: 64, 32>}, {pipeline_mode = #tpu.pipeline_mode<synchronous>, transform_indices = @transform_9, window_bounds = array<i64: 1, 32>}, {pipeline_mode = #tpu.pipeline_mode<synchronous>, transform_indices = @transform_10, window_bounds = array<i64: 1, 32>}, {pipeline_mode = #tpu.pipeline_mode<synchronous>, transform_indices = @transform_11, window_bounds = array<i64: 1, 32>}, {transform_indices = @transform_12, window_bounds = array<i64: 2, 8, 32>}]} {
    %c0 = arith.constant 0 : index
    %c0_0 = arith.constant 0 : index
    %c0_1 = arith.constant 0 : index
    %0 = vector.load %arg1[%c0, %c0_0, %c0_1] : memref<2x8x32xf32, #tpu.memory_space<vmem>>, vector<2x8x32xf32>
    %1 = vector.shape_cast %0 : vector<2x8x32xf32> to vector<16x32xf32>
    %c0_2 = arith.constant 0 : index
    %c0_3 = arith.constant 0 : index
    %c0_4 = arith.constant 0 : index
    %2 = vector.load %arg2[%c0_2, %c0_3, %c0_4] : memref<2x8x16xf32, #tpu.memory_space<vmem>>, vector<2x8x16xf32>
    %3 = vector.shape_cast %2 : vector<2x8x16xf32> to vector<16x16xf32>
    %c0_5 = arith.constant 0 : index
    %c0_6 = arith.constant 0 : index
    %c0_7 = arith.constant 0 : index
    %4 = vector.load %arg3[%c0_5, %c0_6, %c0_7] : memref<2x8x16xf32, #tpu.memory_space<vmem>>, vector<2x8x16xf32>
    %5 = vector.shape_cast %4 : vector<2x8x16xf32> to vector<16x16xf32>
    %c0_8 = arith.constant 0 : index
    %c0_9 = arith.constant 0 : index
    %6 = vector.load %arg5[%c0_8, %c0_9] : memref<32x64xf32, #tpu.memory_space<vmem>>, vector<32x64xf32>
    %cst = arith.constant dense<0.000000e+00> : vector<16x64xf32>
    %7 = tpu.matmul %1, %6, %cst {dimension_numbers = #tpu.dot_dimension_numbers<[1], [0], [0], [1], [0, 0, 1, 1], [], []>} : vector<16x32xf32>, vector<32x64xf32>, vector<16x64xf32> -> vector<16x64xf32>
    %c0_10 = arith.constant 0 : index
    %c0_11 = arith.constant 0 : index
    %8 = vector.load %arg6[%c0_10, %c0_11] : memref<1x64xf32, #tpu.memory_space<vmem>>, vector<1x64xf32>
    %9 = vector.broadcast %8 : vector<1x64xf32> to vector<16x64xf32>
    %10 = arith.addf %7, %9 : vector<16x64xf32>
    %cst_12 = arith.constant 2.500000e-01 : f32
    %11 = vector.broadcast %cst_12 : f32 to vector<16x64xf32>
    %12 = arith.mulf %10, %11 : vector<16x64xf32>
    %13 = vector.shape_cast %12 : vector<16x64xf32> to vector<2x8x64xf32>
    %c0_13 = arith.constant 0 : index
    %c0_14 = arith.constant 0 : index
    %14 = vector.load %arg7[%c0_13, %c0_14] : memref<16x128xf32, #tpu.memory_space<vmem>>, vector<16x64xf32>
    %cst_15 = arith.constant dense<0.000000e+00> : vector<16x64xf32>
    %15 = tpu.matmul %3, %14, %cst_15 {dimension_numbers = #tpu.dot_dimension_numbers<[1], [0], [0], [1], [0, 0, 1, 1], [], []>} : vector<16x16xf32>, vector<16x64xf32>, vector<16x64xf32> -> vector<16x64xf32>
    %c0_16 = arith.constant 0 : index
    %c0_17 = arith.constant 0 : index
    %16 = vector.load %arg8[%c0_16, %c0_17] : memref<1x128xf32, #tpu.memory_space<vmem>>, vector<1x64xf32>
    %17 = vector.broadcast %16 : vector<1x64xf32> to vector<16x64xf32>
    %18 = arith.addf %15, %17 : vector<16x64xf32>
    %c0_18 = arith.constant 0 : index
    %c64 = arith.constant 64 : index
    %19 = vector.load %arg7[%c0_18, %c64] : memref<16x128xf32, #tpu.memory_space<vmem>>, vector<16x64xf32>
    %cst_19 = arith.constant dense<0.000000e+00> : vector<16x64xf32>
    %20 = tpu.matmul %5, %19, %cst_19 {dimension_numbers = #tpu.dot_dimension_numbers<[1], [0], [0], [1], [0, 0, 1, 1], [], []>} : vector<16x16xf32>, vector<16x64xf32>, vector<16x64xf32> -> vector<16x64xf32>
    %c0_20 = arith.constant 0 : index
    %c64_21 = arith.constant 64 : index
    %21 = vector.load %arg8[%c0_20, %c64_21] : memref<1x128xf32, #tpu.memory_space<vmem>>, vector<1x64xf32>
    %22 = vector.broadcast %21 : vector<1x64xf32> to vector<16x64xf32>
    %23 = arith.addf %20, %22 : vector<16x64xf32>
    %24 = vector.shape_cast %18 : vector<16x64xf32> to vector<2x8x64xf32>
    %25 = vector.shape_cast %23 : vector<16x64xf32> to vector<2x8x64xf32>
    %c0_22 = arith.constant 0 : index
    %c0_23 = arith.constant 0 : index
    %c0_24 = arith.constant 0 : index
    %26 = vector.load %arg4[%c0_22, %c0_23, %c0_24] : memref<2x8x8xf32, #tpu.memory_space<vmem>>, vector<2x8x8xf32>
    %cst_25 = arith.constant -1.000000e+30 : f32
    %27 = vector.broadcast %cst_25 : f32 to vector<2x8x8xf32>
    %28 = arith.mulf %26, %27 : vector<2x8x8xf32>
    %c0_26 = arith.constant 0 : index
    %c0_27 = arith.constant 0 : index
    %29 = vector.load %arg10[%c0_26, %c0_27] : memref<1x32xf32, #tpu.memory_space<vmem>>, vector<1x32xf32>
    %30 = vector.broadcast %29 : vector<1x32xf32> to vector<16x32xf32>
    %31 = arith.addf %1, %30 : vector<16x32xf32>
    %32 = vector.extract_strided_slice %13 {offsets = [0, 0, 0], sizes = [2, 8, 16], strides = [1, 1, 1]} : vector<2x8x64xf32> to vector<2x8x16xf32>
    %33 = vector.extract_strided_slice %24 {offsets = [0, 0, 0], sizes = [2, 8, 16], strides = [1, 1, 1]} : vector<2x8x64xf32> to vector<2x8x16xf32>
    %34 = vector.extract_strided_slice %25 {offsets = [0, 0, 0], sizes = [2, 8, 16], strides = [1, 1, 1]} : vector<2x8x64xf32> to vector<2x8x16xf32>
    "tpu.trace_start"() <{level = 10 : i32, message = "bqd,bkd->bqk"}> : () -> ()
    %cst_28 = arith.constant dense<0.000000e+00> : vector<2x8x8xf32>
    %35 = tpu.matmul %32, %33, %cst_28 {dimension_numbers = #tpu.dot_dimension_numbers<[2], [2], [1], [1], [0, 0, 0, 1, 1, 1], [0], [0]>} : vector<2x8x16xf32>, vector<2x8x16xf32>, vector<2x8x8xf32> -> vector<2x8x8xf32>
    "tpu.trace_stop"() : () -> ()
    %36 = arith.addf %35, %28 : vector<2x8x8xf32>
    %cst_29 = arith.constant dense<0xFF800000> : vector<2x8xf32>
    %37 = vector.multi_reduction <maximumf>, %36, %cst_29 [2] : vector<2x8x8xf32> to vector<2x8xf32>
    %38 = vector.shape_cast %37 : vector<2x8xf32> to vector<2x8x1xf32>
    %39 = vector.broadcast %38 : vector<2x8x1xf32> to vector<2x8x8xf32>
    %40 = arith.subf %36, %39 : vector<2x8x8xf32>
    %41 = math.exp %40 : vector<2x8x8xf32>
    %cst_30 = arith.constant dense<0.000000e+00> : vector<2x8xf32>
    %42 = vector.multi_reduction <add>, %41, %cst_30 [2] : vector<2x8x8xf32> to vector<2x8xf32>
    %43 = vector.shape_cast %42 : vector<2x8xf32> to vector<2x8x1xf32>
    %44 = tpu.reciprocal %43 : vector<2x8x1xf32> -> vector<2x8x1xf32>
    %45 = vector.broadcast %44 : vector<2x8x1xf32> to vector<2x8x8xf32>
    %46 = arith.mulf %41, %45 : vector<2x8x8xf32>
    "tpu.trace_start"() <{level = 10 : i32, message = "bqk,bkd->bqd"}> : () -> ()
    %cst_31 = arith.constant dense<0.000000e+00> : vector<2x8x16xf32>
    %47 = tpu.matmul %46, %34, %cst_31 {dimension_numbers = #tpu.dot_dimension_numbers<[2], [1], [1], [2], [0, 0, 0, 1, 1, 2], [0], [0]>} : vector<2x8x8xf32>, vector<2x8x16xf32>, vector<2x8x16xf32> -> vector<2x8x16xf32>
    "tpu.trace_stop"() : () -> ()
    %48 = vector.shape_cast %47 : vector<2x8x16xf32> to vector<16x16xf32>
    %c0_32 = arith.constant 0 : index
    %c0_33 = arith.constant 0 : index
    %49 = vector.load %arg9[%c0_32, %c0_33] : memref<64x32xf32, #tpu.memory_space<vmem>>, vector<16x32xf32>
    %cst_34 = arith.constant dense<0.000000e+00> : vector<16x32xf32>
    %50 = tpu.matmul %48, %49, %cst_34 {dimension_numbers = #tpu.dot_dimension_numbers<[1], [0], [0], [1], [0, 0, 1, 1], [], []>} : vector<16x16xf32>, vector<16x32xf32>, vector<16x32xf32> -> vector<16x32xf32>
    %51 = arith.addf %31, %50 : vector<16x32xf32>
    %52 = vector.extract_strided_slice %13 {offsets = [0, 0, 16], sizes = [2, 8, 16], strides = [1, 1, 1]} : vector<2x8x64xf32> to vector<2x8x16xf32>
    %53 = vector.extract_strided_slice %24 {offsets = [0, 0, 16], sizes = [2, 8, 16], strides = [1, 1, 1]} : vector<2x8x64xf32> to vector<2x8x16xf32>
    %54 = vector.extract_strided_slice %25 {offsets = [0, 0, 16], sizes = [2, 8, 16], strides = [1, 1, 1]} : vector<2x8x64xf32> to vector<2x8x16xf32>
    "tpu.trace_start"() <{level = 10 : i32, message = "bqd,bkd->bqk"}> : () -> ()
    %cst_35 = arith.constant dense<0.000000e+00> : vector<2x8x8xf32>
    %55 = tpu.matmul %52, %53, %cst_35 {dimension_numbers = #tpu.dot_dimension_numbers<[2], [2], [1], [1], [0, 0, 0, 1, 1, 1], [0], [0]>} : vector<2x8x16xf32>, vector<2x8x16xf32>, vector<2x8x8xf32> -> vector<2x8x8xf32>
    "tpu.trace_stop"() : () -> ()
    %56 = arith.addf %55, %28 : vector<2x8x8xf32>
    %cst_36 = arith.constant dense<0xFF800000> : vector<2x8xf32>
    %57 = vector.multi_reduction <maximumf>, %56, %cst_36 [2] : vector<2x8x8xf32> to vector<2x8xf32>
    %58 = vector.shape_cast %57 : vector<2x8xf32> to vector<2x8x1xf32>
    %59 = vector.broadcast %58 : vector<2x8x1xf32> to vector<2x8x8xf32>
    %60 = arith.subf %56, %59 : vector<2x8x8xf32>
    %61 = math.exp %60 : vector<2x8x8xf32>
    %cst_37 = arith.constant dense<0.000000e+00> : vector<2x8xf32>
    %62 = vector.multi_reduction <add>, %61, %cst_37 [2] : vector<2x8x8xf32> to vector<2x8xf32>
    %63 = vector.shape_cast %62 : vector<2x8xf32> to vector<2x8x1xf32>
    %64 = tpu.reciprocal %63 : vector<2x8x1xf32> -> vector<2x8x1xf32>
    %65 = vector.broadcast %64 : vector<2x8x1xf32> to vector<2x8x8xf32>
    %66 = arith.mulf %61, %65 : vector<2x8x8xf32>
    "tpu.trace_start"() <{level = 10 : i32, message = "bqk,bkd->bqd"}> : () -> ()
    %cst_38 = arith.constant dense<0.000000e+00> : vector<2x8x16xf32>
    %67 = tpu.matmul %66, %54, %cst_38 {dimension_numbers = #tpu.dot_dimension_numbers<[2], [1], [1], [2], [0, 0, 0, 1, 1, 2], [0], [0]>} : vector<2x8x8xf32>, vector<2x8x16xf32>, vector<2x8x16xf32> -> vector<2x8x16xf32>
    "tpu.trace_stop"() : () -> ()
    %68 = vector.shape_cast %67 : vector<2x8x16xf32> to vector<16x16xf32>
    %c16 = arith.constant 16 : index
    %c0_39 = arith.constant 0 : index
    %69 = vector.load %arg9[%c16, %c0_39] : memref<64x32xf32, #tpu.memory_space<vmem>>, vector<16x32xf32>
    %cst_40 = arith.constant dense<0.000000e+00> : vector<16x32xf32>
    %70 = tpu.matmul %68, %69, %cst_40 {dimension_numbers = #tpu.dot_dimension_numbers<[1], [0], [0], [1], [0, 0, 1, 1], [], []>} : vector<16x16xf32>, vector<16x32xf32>, vector<16x32xf32> -> vector<16x32xf32>
    %71 = arith.addf %51, %70 : vector<16x32xf32>
    %72 = vector.extract_strided_slice %13 {offsets = [0, 0, 32], sizes = [2, 8, 16], strides = [1, 1, 1]} : vector<2x8x64xf32> to vector<2x8x16xf32>
    %73 = vector.extract_strided_slice %24 {offsets = [0, 0, 32], sizes = [2, 8, 16], strides = [1, 1, 1]} : vector<2x8x64xf32> to vector<2x8x16xf32>
    %74 = vector.extract_strided_slice %25 {offsets = [0, 0, 32], sizes = [2, 8, 16], strides = [1, 1, 1]} : vector<2x8x64xf32> to vector<2x8x16xf32>
    "tpu.trace_start"() <{level = 10 : i32, message = "bqd,bkd->bqk"}> : () -> ()
    %cst_41 = arith.constant dense<0.000000e+00> : vector<2x8x8xf32>
    %75 = tpu.matmul %72, %73, %cst_41 {dimension_numbers = #tpu.dot_dimension_numbers<[2], [2], [1], [1], [0, 0, 0, 1, 1, 1], [0], [0]>} : vector<2x8x16xf32>, vector<2x8x16xf32>, vector<2x8x8xf32> -> vector<2x8x8xf32>
    "tpu.trace_stop"() : () -> ()
    %76 = arith.addf %75, %28 : vector<2x8x8xf32>
    %cst_42 = arith.constant dense<0xFF800000> : vector<2x8xf32>
    %77 = vector.multi_reduction <maximumf>, %76, %cst_42 [2] : vector<2x8x8xf32> to vector<2x8xf32>
    %78 = vector.shape_cast %77 : vector<2x8xf32> to vector<2x8x1xf32>
    %79 = vector.broadcast %78 : vector<2x8x1xf32> to vector<2x8x8xf32>
    %80 = arith.subf %76, %79 : vector<2x8x8xf32>
    %81 = math.exp %80 : vector<2x8x8xf32>
    %cst_43 = arith.constant dense<0.000000e+00> : vector<2x8xf32>
    %82 = vector.multi_reduction <add>, %81, %cst_43 [2] : vector<2x8x8xf32> to vector<2x8xf32>
    %83 = vector.shape_cast %82 : vector<2x8xf32> to vector<2x8x1xf32>
    %84 = tpu.reciprocal %83 : vector<2x8x1xf32> -> vector<2x8x1xf32>
    %85 = vector.broadcast %84 : vector<2x8x1xf32> to vector<2x8x8xf32>
    %86 = arith.mulf %81, %85 : vector<2x8x8xf32>
    "tpu.trace_start"() <{level = 10 : i32, message = "bqk,bkd->bqd"}> : () -> ()
    %cst_44 = arith.constant dense<0.000000e+00> : vector<2x8x16xf32>
    %87 = tpu.matmul %86, %74, %cst_44 {dimension_numbers = #tpu.dot_dimension_numbers<[2], [1], [1], [2], [0, 0, 0, 1, 1, 2], [0], [0]>} : vector<2x8x8xf32>, vector<2x8x16xf32>, vector<2x8x16xf32> -> vector<2x8x16xf32>
    "tpu.trace_stop"() : () -> ()
    %88 = vector.shape_cast %87 : vector<2x8x16xf32> to vector<16x16xf32>
    %c32 = arith.constant 32 : index
    %c0_45 = arith.constant 0 : index
    %89 = vector.load %arg9[%c32, %c0_45] : memref<64x32xf32, #tpu.memory_space<vmem>>, vector<16x32xf32>
    %cst_46 = arith.constant dense<0.000000e+00> : vector<16x32xf32>
    %90 = tpu.matmul %88, %89, %cst_46 {dimension_numbers = #tpu.dot_dimension_numbers<[1], [0], [0], [1], [0, 0, 1, 1], [], []>} : vector<16x16xf32>, vector<16x32xf32>, vector<16x32xf32> -> vector<16x32xf32>
    %91 = arith.addf %71, %90 : vector<16x32xf32>
    %92 = vector.extract_strided_slice %13 {offsets = [0, 0, 48], sizes = [2, 8, 16], strides = [1, 1, 1]} : vector<2x8x64xf32> to vector<2x8x16xf32>
    %93 = vector.extract_strided_slice %24 {offsets = [0, 0, 48], sizes = [2, 8, 16], strides = [1, 1, 1]} : vector<2x8x64xf32> to vector<2x8x16xf32>
    %94 = vector.extract_strided_slice %25 {offsets = [0, 0, 48], sizes = [2, 8, 16], strides = [1, 1, 1]} : vector<2x8x64xf32> to vector<2x8x16xf32>
    "tpu.trace_start"() <{level = 10 : i32, message = "bqd,bkd->bqk"}> : () -> ()
    %cst_47 = arith.constant dense<0.000000e+00> : vector<2x8x8xf32>
    %95 = tpu.matmul %92, %93, %cst_47 {dimension_numbers = #tpu.dot_dimension_numbers<[2], [2], [1], [1], [0, 0, 0, 1, 1, 1], [0], [0]>} : vector<2x8x16xf32>, vector<2x8x16xf32>, vector<2x8x8xf32> -> vector<2x8x8xf32>
    "tpu.trace_stop"() : () -> ()
    %96 = arith.addf %95, %28 : vector<2x8x8xf32>
    %cst_48 = arith.constant dense<0xFF800000> : vector<2x8xf32>
    %97 = vector.multi_reduction <maximumf>, %96, %cst_48 [2] : vector<2x8x8xf32> to vector<2x8xf32>
    %98 = vector.shape_cast %97 : vector<2x8xf32> to vector<2x8x1xf32>
    %99 = vector.broadcast %98 : vector<2x8x1xf32> to vector<2x8x8xf32>
    %100 = arith.subf %96, %99 : vector<2x8x8xf32>
    %101 = math.exp %100 : vector<2x8x8xf32>
    %cst_49 = arith.constant dense<0.000000e+00> : vector<2x8xf32>
    %102 = vector.multi_reduction <add>, %101, %cst_49 [2] : vector<2x8x8xf32> to vector<2x8xf32>
    %103 = vector.shape_cast %102 : vector<2x8xf32> to vector<2x8x1xf32>
    %104 = tpu.reciprocal %103 : vector<2x8x1xf32> -> vector<2x8x1xf32>
    %105 = vector.broadcast %104 : vector<2x8x1xf32> to vector<2x8x8xf32>
    %106 = arith.mulf %101, %105 : vector<2x8x8xf32>
    "tpu.trace_start"() <{level = 10 : i32, message = "bqk,bkd->bqd"}> : () -> ()
    %cst_50 = arith.constant dense<0.000000e+00> : vector<2x8x16xf32>
    %107 = tpu.matmul %106, %94, %cst_50 {dimension_numbers = #tpu.dot_dimension_numbers<[2], [1], [1], [2], [0, 0, 0, 1, 1, 2], [0], [0]>} : vector<2x8x8xf32>, vector<2x8x16xf32>, vector<2x8x16xf32> -> vector<2x8x16xf32>
    "tpu.trace_stop"() : () -> ()
    %108 = vector.shape_cast %107 : vector<2x8x16xf32> to vector<16x16xf32>
    %c48 = arith.constant 48 : index
    %c0_51 = arith.constant 0 : index
    %109 = vector.load %arg9[%c48, %c0_51] : memref<64x32xf32, #tpu.memory_space<vmem>>, vector<16x32xf32>
    %cst_52 = arith.constant dense<0.000000e+00> : vector<16x32xf32>
    %110 = tpu.matmul %108, %109, %cst_52 {dimension_numbers = #tpu.dot_dimension_numbers<[1], [0], [0], [1], [0, 0, 1, 1], [], []>} : vector<16x16xf32>, vector<16x32xf32>, vector<16x32xf32> -> vector<16x32xf32>
    %111 = arith.addf %91, %110 : vector<16x32xf32>
    %cst_53 = arith.constant dense<0.000000e+00> : vector<16xf32>
    %112 = vector.multi_reduction <add>, %111, %cst_53 [1] : vector<16x32xf32> to vector<16xf32>
    %113 = vector.shape_cast %112 : vector<16xf32> to vector<16x1xf32>
    %cst_54 = arith.constant 3.200000e+01 : f32
    %114 = vector.broadcast %cst_54 : f32 to vector<16x1xf32>
    %115 = arith.divf %113, %114 : vector<16x1xf32>
    %116 = vector.broadcast %115 : vector<16x1xf32> to vector<16x32xf32>
    %117 = arith.subf %111, %116 : vector<16x32xf32>
    %118 = arith.mulf %117, %117 : vector<16x32xf32>
    %cst_55 = arith.constant dense<0.000000e+00> : vector<16xf32>
    %119 = vector.multi_reduction <add>, %118, %cst_55 [1] : vector<16x32xf32> to vector<16xf32>
    %120 = vector.shape_cast %119 : vector<16xf32> to vector<16x1xf32>
    %cst_56 = arith.constant 3.200000e+01 : f32
    %121 = vector.broadcast %cst_56 : f32 to vector<16x1xf32>
    %122 = arith.divf %120, %121 : vector<16x1xf32>
    %123 = vector.broadcast %115 : vector<16x1xf32> to vector<16x32xf32>
    %124 = arith.subf %111, %123 : vector<16x32xf32>
    %cst_57 = arith.constant 9.99999974E-6 : f32
    %125 = vector.broadcast %cst_57 : f32 to vector<16x1xf32>
    %126 = arith.addf %122, %125 : vector<16x1xf32>
    %127 = math.rsqrt %126 : vector<16x1xf32>
    %128 = vector.broadcast %127 : vector<16x1xf32> to vector<16x32xf32>
    %129 = arith.mulf %124, %128 : vector<16x32xf32>
    %c0_58 = arith.constant 0 : index
    %c0_59 = arith.constant 0 : index
    %130 = vector.load %arg11[%c0_58, %c0_59] : memref<1x32xf32, #tpu.memory_space<vmem>>, vector<1x32xf32>
    %131 = vector.broadcast %130 : vector<1x32xf32> to vector<16x32xf32>
    %132 = arith.mulf %129, %131 : vector<16x32xf32>
    %c0_60 = arith.constant 0 : index
    %c0_61 = arith.constant 0 : index
    %133 = vector.load %arg12[%c0_60, %c0_61] : memref<1x32xf32, #tpu.memory_space<vmem>>, vector<1x32xf32>
    %134 = vector.broadcast %133 : vector<1x32xf32> to vector<16x32xf32>
    %135 = arith.addf %132, %134 : vector<16x32xf32>
    %136 = vector.shape_cast %135 : vector<16x32xf32> to vector<2x8x32xf32>
    %c0_62 = arith.constant 0 : index
    %c0_63 = arith.constant 0 : index
    %c0_64 = arith.constant 0 : index
    %137 = vector.load %arg13[%c0_62, %c0_63, %c0_64] : memref<2x8x32xf32, #tpu.memory_space<vmem>>, vector<2x8x32xf32>
    tpu.vector_store %arg13[%c0_62, %c0_63, %c0_64], %136 {strides = array<i32>} : memref<2x8x32xf32, #tpu.memory_space<vmem>>, vector<2x8x32xf32>,
    return
  }
  func.func @transform_0(%arg0: i32) -> (i32, i32, i32) {
    %c0_i32 = arith.constant 0 : i32
    %c0_i32_0 = arith.constant 0 : i32
    %c0_i32_1 = arith.constant 0 : i32
    return %arg0, %c0_i32, %c0_i32_0 : i32, i32, i32
  }
  func.func @transform_1(%arg0: i32) -> (i32, i32, i32) {
    %c0_i32 = arith.constant 0 : i32
    %c0_i32_0 = arith.constant 0 : i32
    %c0_i32_1 = arith.constant 0 : i32
    return %arg0, %c0_i32, %c0_i32_0 : i32, i32, i32
  }
  func.func @transform_2(%arg0: i32) -> (i32, i32, i32) {
    %c0_i32 = arith.constant 0 : i32
    %c0_i32_0 = arith.constant 0 : i32
    %c0_i32_1 = arith.constant 0 : i32
    return %arg0, %c0_i32, %c0_i32_0 : i32, i32, i32
  }
  func.func @transform_3(%arg0: i32) -> (i32, i32, i32) {
    %c0_i32 = arith.constant 0 : i32
    %c0_i32_0 = arith.constant 0 : i32
    %c0_i32_1 = arith.constant 0 : i32
    return %arg0, %c0_i32, %c0_i32_0 : i32, i32, i32
  }
  func.func @transform_4(%arg0: i32) -> (i32, i32) {
    %c0_i32 = arith.constant 0 : i32
    %c0_i32_0 = arith.constant 0 : i32
    %c0_i32_1 = arith.constant 0 : i32
    return %c0_i32, %c0_i32_0 : i32, i32
  }
  func.func @transform_5(%arg0: i32) -> (i32, i32) {
    %c0_i32 = arith.constant 0 : i32
    %c0_i32_0 = arith.constant 0 : i32
    %c0_i32_1 = arith.constant 0 : i32
    return %c0_i32, %c0_i32_0 : i32, i32
  }
  func.func @transform_6(%arg0: i32) -> (i32, i32) {
    %c0_i32 = arith.constant 0 : i32
    %c0_i32_0 = arith.constant 0 : i32
    %c0_i32_1 = arith.constant 0 : i32
    return %c0_i32, %c0_i32_0 : i32, i32
  }
  func.func @transform_7(%arg0: i32) -> (i32, i32) {
    %c0_i32 = arith.constant 0 : i32
    %c0_i32_0 = arith.constant 0 : i32
    %c0_i32_1 = arith.constant 0 : i32
    return %c0_i32, %c0_i32_0 : i32, i32
  }
  func.func @transform_8(%arg0: i32) -> (i32, i32) {
    %c0_i32 = arith.constant 0 : i32
    %c0_i32_0 = arith.constant 0 : i32
    %c0_i32_1 = arith.constant 0 : i32
    return %c0_i32, %c0_i32_0 : i32, i32
  }
  func.func @transform_9(%arg0: i32) -> (i32, i32) {
    %c0_i32 = arith.constant 0 : i32
    %c0_i32_0 = arith.constant 0 : i32
    %c0_i32_1 = arith.constant 0 : i32
    return %c0_i32, %c0_i32_0 : i32, i32
  }
  func.func @transform_10(%arg0: i32) -> (i32, i32) {
    %c0_i32 = arith.constant 0 : i32
    %c0_i32_0 = arith.constant 0 : i32
    %c0_i32_1 = arith.constant 0 : i32
    return %c0_i32, %c0_i32_0 : i32, i32
  }
  func.func @transform_11(%arg0: i32) -> (i32, i32) {
    %c0_i32 = arith.constant 0 : i32
    %c0_i32_0 = arith.constant 0 : i32
    %c0_i32_1 = arith.constant 0 : i32
    return %c0_i32, %c0_i32_0 : i32, i32
  }
  func.func @transform_12(%arg0: i32) -> (i32, i32, i32) {
    %c0_i32 = arith.constant 0 : i32
    %c0_i32_0 = arith.constant 0 : i32
    %c0_i32_1 = arith.constant 0 : i32
    return %arg0, %c0_i32, %c0_i32_0 : i32, i32, i32
  }
}

</mosaic_0001>

<bundles_post_ra>
// kernel: tpu_custom_call.1
= control target key start
LH: loop header
LB: loop body
LE: loop exit
PB: predicated region body
PF: predicated region fallthrough
CT: control target
= control target key end

     0   :  { %17 = vsyncpa [#allocation3], 0  ;;  %s1489_s0 = inlined_call_operand.vmem [shape: f32[2,8,32], index: 0, kind: input, shape index: {}]   ;;  %s1490_s1 = inlined_call_operand.vmem [shape: f32[2,8,16], index: 1, kind: input, shape index: {}]   ;;  %s1491_s2 = inlined_call_operand.vmem [shape: f32[2,8,16], index: 2, kind: input, shape index: {}]   ;;  %s1492_s3 = inlined_call_operand.vmem [shape: f32[2,8,8], index: 3, kind: input, shape index: {}]   ;;  %s1493_s4 = inlined_call_operand.vmem [shape: f32[32,64], index: 4, kind: input, shape index: {}]   ;;  %s1494_s5 = inlined_call_operand.vmem [shape: f32[1,64], index: 5, kind: input, shape index: {}]   ;;  %s1495_s6 = inlined_call_operand.hbm [shape: f32[16,128], index: 6, kind: input, shape index: {}]   ;;  %s1496_s7 = inlined_call_operand.vmem [shape: f32[1,128], index: 7, kind: input, shape index: {}]   ;;  %s1497_s8 = inlined_call_operand.vmem [shape: f32[64,32], index: 8, kind: input, shape index: {}]   ;;  %s1498_s9 = inlined_call_operand.vmem [shape: f32[1,32], index: 9, kind: input, shape index: {}]   ;;  %s1499_s10 = inlined_call_operand.vmem [shape: f32[1,32], index: 10, kind: input, shape index: {}]   ;;  %s1500_s11 = inlined_call_operand.vmem [shape: f32[1,32], index: 11, kind: input, shape index: {}]   ;;  %s1501_s12 = inlined_call_operand.hbm [shape: f32[2,8,32], index: 12, kind: output, shape index: {}]  }
   0x1   :  { %18 = vsyncpa [#allocation4], 0  ;;  %s35_s23 = sshll.u32 %s1495_s6, 4  ;;  %s1172_s24 = smov [#allocation2]   ;;  %s36_s23 = int_to_ptr.hbm [resolvable:$true] %s35_s23 }
   0x2   :  { %s37_s25 = sshll.u32 %s1172_s24, 4  ;;  %s1173_s26 = smov 128   ;;  %s38_s25 = int_to_ptr.vmem [resolvable:$true] %s37_s25 }
   0x3   :  { %s1174_s27 = smov 8  }
   0x4   :  { %43 = dma.hbm_to_vmem [thread:$0]  %s36_s23, 256, %s38_s25, [#allocation3], %s1173_s26, %s1173_s26, %s1174_s27  }
   0x5   :  { %1168 = dma.done.wait [#allocation3], 256  }
   0x6   :  { %1169 = vsyncadd [#allocation3], 4294967040  ;;  %v67_v0 = vld [vmem:[%s1493_s4 + $0x18] sm:$0xff]  ;;  %v66_v1 = vld [vmem:[%s1493_s4 + $0x10] sm:$0xff]  ;;  %vm110_vm0 = vcmask 130048   ;;  %vm72_vm1 = vcmask 261120  }
   0x7   :  { %v105_v2 = vld [vmem:[#allocation2 + $0x8] sm:$0xff]  ;;  %91 = vmatpush.msra.mxu0 %v67_v0  ;;  %v104_v3 = vld [vmem:[#allocation2] sm:$0xff]  ;;  %s1176_s30 = smov 112   ;;  %vm242_vm2 = vcmask 64512   ;;  %s1177_s6 = smov 96  }
   0x8   :  { %131 = vmatpush.msra.mxu1 %v105_v2  ;;  %v65_v4 = vld [vmem:[%s1493_s4 + $0x8] sm:$0xff]  ;;  %1061 = vmatpush.msra.mxu2 %v105_v2  ;;  %v60_v5 = vld [vmem:[%s1490_s1] sm:$0xff]  ;;  %v1072_v7 = vpack.i.bf16 %v104_v3, %v105_v2  ;;  %s1178_s22 = smov 80  }
   0x9   :  { %v61_v6 = vld [vmem:[%s1490_s1 + $0x8] sm:$0xff]  ;;  %92 = vmatpush.msra.mxu0 %v66_v1  ;;  %v64_v8 = vld [vmem:[%s1493_s4] sm:$0xff]  ;;  %s1175_s1 = smov 64  }
   0xa   :  { %132 = vmatpush.msra.mxu1 %v104_v3  ;;  %1062 = vmatpush.msra.mxu2 %v104_v3  ;;  %v1274_v9 = vld [vmem:[%s1489_s0] sm:$0xff]  ;;  %v1283_v10 = vld [vmem:[%s1489_s0 + $0x8] sm:$0xff] }
   0xb   :  { %1025 = vmatmul.msk.f32.vlgmr.msra.gmra.mxu1 %vm110_vm0, %v60_v5  ;;  %93 = vmatpush.msra.mxu0 %v65_v4  ;;  %v1290_v11 = vld [vmem:[%s1496_s7] ss:$0 sm:$0xff]  ;;  %v181_v32 = vld [vmem:[%s1492_s3 + $0x8] sm:$0xff] }
   0xc   :  { %1026 = vmatmul.msk.f32.vlgmr.msra.gmra.mxu2 %vm110_vm0, %v61_v6  ;;  %1073 = vrot.lane.b32.xlu0 %v1072_v7, %s1175_s1  ;;  %v1078_v14 = vld [vmem:[%s1494_s5] ss:$0 sm:$0xff]  ;;  %v1333_v34 = vmul.f32 -1e+30, %v181_v32  ;;  %v63_v39 = vld [vmem:[%s1491_s2 + $0x8] sm:$0xff] }
   0xd   :  { %94 = vmatpush.msra.mxu0 %v64_v8  ;;  %v180_v26 = vld [vmem:[%s1492_s3] sm:$0xff] }
   0xe   :  { %1023 = vmatmul.msk.f32.vlgmr.msra.gmra.mxu0 %vm72_vm1, %v1274_v9  ;;  %v1326_v27 = vmul.f32 -1e+30, %v180_v26  ;;  %v62_v38 = vld [vmem:[%s1491_s2] sm:$0xff]  ;;  %s1010_s2 = sshll.u32 %s1501_s12, 4  ;;  %s1011_s2 = int_to_ptr.hbm [resolvable:$true] %s1010_s2 }
  0x16   :  { %1024 = vmatmul.msk.f32.gmra.mxu0 %vm72_vm1, %v1283_v10 }
  0x7e   :  { %v1074_v23 = vpop.permute.xlu0 %1073 }
  0x7f   :  { %v1075_v29 = vunpack.i.l.bf16 %v1074_v23  ;;  %v1076_v30 = vunpack.i.h.bf16 %v1074_v23 }
  0x81   :  { %171 = vmatpush.msrb.mxu2 %v1075_v29 }
  0x83   :  { %172 = vmatpush.msrb.mxu2 %v1076_v30  ;;  %v338_v30 = vld [vmem:[%s1497_s8 + $0x8] sm:$0xff] }
  0x84   :  { %1027 = vmatmul.msk.f32.vlgmr.msrb.gmra.mxu2 %vm110_vm0, %v62_v38 }
  0x88   :  { %v134_v12 = vpop.f32.mrf.mxu1 }
  0x89   :  { %v1293_v13 = vadd.f32 %v1290_v11, %v134_v12 }
  0x8b   :  { %372 = vrot.lane.b32.xlu0 %v1293_v13, %s1176_s30  ;;  %1029 = vmatpush.xpose.msk.msra.mxu3 %vm110_vm0, %v1293_v13  ;;  %v96_v15 = vpop.f32.mrf.mxu0 }
  0x8c   :  { %v97_v16 = vadd.f32 %v1078_v14, %v96_v15  ;;  %1028 = vmatmul.msk.f32.gmra.mxu2 %vm110_vm0, %v63_v39 }
  0x8e   :  { %v1302_v17 = vmul.f32 0.25, %v97_v16 }
  0x8f   :  { %v137_v18 = vpop.f32.mrf.mxu2 }
  0x90   :  { %v1305_v19 = vadd.f32 %v1290_v11, %v137_v18  ;;  %370 = vrot.lane.b32.xlu1 %v1302_v17, %s1176_s30  ;;  %1030 = vmatmul.msk.f32.vlgmr.msra.gmra.mxu3 %vm110_vm0, %v1302_v17 }
  0x92   :  { %1031 = vmatpush.xpose.msk.msrb.mxu3 %vm110_vm0, %v1305_v19 }
  0x93   :  { %400 = vrot.lane.b32.xlu0 %v1305_v19, %s1176_s30  ;;  %v99_v20 = vpop.f32.mrf.mxu0 }
  0x94   :  { %v100_v21 = vadd.f32 %v1078_v14, %v99_v20 }
  0x96   :  { %v1315_v22 = vmul.f32 0.25, %v100_v21  ;;  %359 = vmatpush.msra.mxu3 %v338_v30 }
  0x98   :  { %1032 = vmatmul.msk.f32.vlgmr.msrb.gmra.mxu3 %vm110_vm0, %v1315_v22 }
  0x9b   :  { %398 = vrot.lane.b32.xlu0 %v1315_v22, %s1176_s30 }
  0xfd   :  { %v373_v24 = vpop.permute.xlu0 %372 }
  0xfe   :  { %1037 = vmatpush.xpose.msk.msrb.mxu0 %vm110_vm0, %v373_v24 }
 0x102   :  { %v371_v25 = vpop.permute.xlu1 %370 }
 0x103   :  { %1038 = vmatmul.msk.f32.vlgmr.msrb.gmra.mxu0 %vm110_vm0, %v371_v25 }
 0x105   :  { %v401_v40 = vpop.permute.xlu0 %400 }
 0x107   :  { %v174_v55 = vpop.f32.mrf.mxu2 }
 0x10d   :  { %v1347_v41 = vpop.permute.xlu0 %398 }
 0x10f   :  { %v177_v57 = vpop.f32.mrf.mxu2 }
 0x113   :  { %v213_v28 = vpop.f32.mrf.mxu3 }
 0x114   :  { %v214_v31 = vadd.f32 %v213_v28, %v1326_v27 }
 0x116   :  { %v243_v33 = vsel %vm242_vm2, %v214_v31, -inf }
 0x117   :  { %244 = vmax.xlane.f32.xlu1 %v243_v33 }
 0x11b   :  { %v239_v35 = vpop.f32.mrf.mxu3 }
 0x11c   :  { %v240_v36 = vadd.f32 %v239_v35, %v1333_v34 }
 0x11e   :  { %v246_v37 = vsel %vm242_vm2, %v240_v36, -inf }
 0x11f   :  { %247 = vmax.xlane.f32.xlu0 %v246_v37 }
 0x133   :  { %561 = vrot.lane.b32.xlu0 %v1302_v17, %s1177_s6 }
 0x180   :  { %v395_v52 = vpop.f32.mrf.mxu0 }
 0x181   :  { %v396_v53 = vadd.f32 %v395_v52, %v1326_v27 }
 0x183   :  { %v426_v54 = vsel %vm242_vm2, %v396_v53, -inf }
 0x18a   :  { %v245_v42 = vpop.xlane.xlu1 %244 }
 0x18b   :  { %v249_v43 = vsub.f32 %v214_v31, %v245_v42 }
 0x18d   :  { %v251_v44 = vmul.f32 1.442695, %v249_v43 }
 0x18f   :  { %1082 = vpow2.f32 %v251_v44 }
 0x192   :  { %v248_v45 = vpop.xlane.xlu0 %247 }
 0x193   :  { %v250_v46 = vsub.f32 %v240_v36, %v248_v45  ;;  %v337_v36 = vld [vmem:[%s1497_s8] sm:$0xff] }
 0x194   :  { %360 = vmatpush.msra.mxu3 %v337_v36 }
 0x195   :  { %v1083_v47 = vpop.eup %1082  ;;  %v253_v48 = vmul.f32 1.442695, %v250_v46 }
 0x196   :  { %v255_v49 = vsel %vm242_vm2, %v1083_v47, 0.0 }
 0x197   :  { %1084 = vpow2.f32 %v253_v48  ;;  %256 = vadd.xlane.f32.xlu2 %v255_v49 }
 0x19d   :  { %v1085_v50 = vpop.eup %1084 }
 0x19e   :  { %v258_v51 = vsel %vm242_vm2, %v1085_v50, 0.0 }
 0x19f   :  { %259 = vadd.xlane.f32.xlu1 %v258_v51 }
 0x1af   :  { %148 = vrot.lane.b32.xlu2 %v1290_v11, %s1175_s1 }
 0x1d8   :  { %427 = vmax.xlane.f32.xlu2 %v426_v54 }
 0x1f0   :  { %563 = vrot.lane.b32.xlu2 %v1293_v13, %s1177_s6 }
 0x20a   :  { %v257_v56 = vpop.xlane.xlu2 %256 }
 0x20b   :  { %1086 = vrcp.f32 %v257_v56  ;;  %v272_v1 = vand.u32 2147483648, %v257_v56  ;;  %v270_v3 = vand.u32 2147483647, %v257_v56  ;;  %vm266_vm4 = vweird.f32 %v257_v56 }
 0x20d   :  { %v273_v6 = vor.u32 1.1754944e-38, %v272_v1  ;;  %vm271_vm6 = vcmp.eq.f32.partialorder %v270_v3, 8.507059e+37 }
 0x211   :  { %v1087_v58 = vpop.eup %1086 }
 0x212   :  { %v262_v59 = vmul.f32 %v1087_v58, %v257_v56  ;;  %v149_v60 = vpop.permute.xlu2 %148  ;;  %v260_v61 = vpop.xlane.xlu1 %259  ;;  %vm267_vm3 = vweird.f32 %v1087_v58 }
 0x213   :  { %v1357_v62 = vadd.f32 %v174_v55, %v149_v60  ;;  %v1359_v63 = vadd.f32 %v177_v57, %v149_v60  ;;  %1088 = vrcp.f32 %v260_v61  ;;  %vm268_vm5 = vmor %vm266_vm4, %vm267_vm3  ;;  %vm280_vm7 = vweird.f32 %v260_v61  ;;  %v562_v55 = vpop.permute.xlu0 %561 }
 0x214   :  { %v263_v0 = vsub.f32 1.0, %v262_v59  ;;  %v286_v11 = vand.u32 2147483648, %v260_v61  ;;  %v284_v15 = vand.u32 2147483647, %v260_v61 }
 0x215   :  { %502 = vrot.lane.b32.xlu2 %v1359_v63, %s1176_s30  ;;  %309 = vmatpush.msrb.mxu1 %v1357_v62 }
 0x216   :  { %v264_v2 = vmul.f32 %v1087_v58, %v263_v0  ;;  %332 = vmatpush.msra.mxu2 %v1359_v63  ;;  %v287_v20 = vor.u32 1.1754944e-38, %v286_v11  ;;  %vm285_vm10 = vcmp.eq.f32.partialorder %v284_v15, 8.507059e+37  ;;  %v528_v0 = vld [vmem:[%s1497_s8 + $0x10] sm:$0xff] }
 0x217   :  { %1039 = vmatpush.xpose.msk.msra.mxu1 %vm110_vm0, %v401_v40 }
 0x218   :  { %v265_v4 = vadd.f32 %v1087_v58, %v264_v2 }
 0x219   :  { %v1089_v5 = vpop.eup %1088 }
 0x21a   :  { %v276_v7 = vmul.f32 %v1089_v5, %v260_v61  ;;  %v269_v8 = vsel %vm268_vm5, %v1087_v58, %v265_v4  ;;  %vm281_vm8 = vweird.f32 %v1089_v5  ;;  %v529_v61 = vld [vmem:[%s1497_s8 + $0x18] sm:$0xff] }
 0x21b   :  { %v274_v12 = vsel %vm271_vm6, %v273_v6, %v269_v8  ;;  %vm282_vm9 = vmor %vm280_vm7, %vm281_vm8 }
 0x21c   :  { %v277_v14 = vsub.f32 1.0, %v276_v7  ;;  %v289_v16 = vmul.f32 %v1083_v47, %v274_v12 }
 0x21e   :  { %v278_v18 = vmul.f32 %v1089_v5, %v277_v14  ;;  %1033 = vmatmul.msk.f32.vlgmr.msrb.gmra.mxu1 %vm242_vm2, %v289_v16 }
 0x21f   :  { %550 = vmatpush.msrb.mxu1 %v529_v61 }
 0x220   :  { %v279_v21 = vadd.f32 %v1089_v5, %v278_v18 }
 0x221   :  { %551 = vmatpush.msrb.mxu1 %v528_v0 }
 0x222   :  { %v283_v23 = vsel %vm282_vm9, %v1089_v5, %v279_v21 }
 0x223   :  { %v288_v24 = vsel %vm285_vm10, %v287_v20, %v283_v23 }
 0x224   :  { %v290_v25 = vmul.f32 %v1085_v50, %v288_v24 }
 0x226   :  { %1034 = vmatmul.msk.f32.vlgmr.msra.gmra.mxu2 %vm242_vm2, %v290_v25  ;;  %1040 = vmatmul.msk.f32.vlgmr.msra.gmra.mxu1 %vm110_vm0, %v1347_v41 }
 0x24b   :  { %v428_v26 = vpop.xlane.xlu2 %427 }
 0x24c   :  { %v432_v28 = vsub.f32 %v396_v53, %v428_v26 }
 0x24e   :  { %v434_v29 = vmul.f32 1.442695, %v432_v28 }
 0x250   :  { %1090 = vpow2.f32 %v434_v29 }
 0x253   :  { %v564_v33 = vpop.permute.xlu2 %563 }
 0x256   :  { %v1091_v31 = vpop.eup %1090 }
 0x257   :  { %v438_v32 = vsel %vm242_vm2, %v1091_v31, 0.0 }
 0x258   :  { %439 = vadd.xlane.f32.xlu1 %v438_v32 }
 0x26f   :  { %v503_v35 = vpop.permute.xlu2 %502 }
 0x270   :  { %523 = vmatpush.msra.mxu0 %v503_v35 }
 0x271   :  { %475 = vrot.lane.b32.xlu1 %v1357_v62, %s1176_s30 }
 0x29b   :  { %v311_v37 = vpop.f32.mrf.mxu1 }
 0x29c   :  { %1035 = vmatmul.msk.f32.vlgmr.msra.gmra.mxu3 %vm110_vm0, %v311_v37 }
 0x2a3   :  { %v423_v38 = vpop.f32.mrf.mxu1 }
 0x2a4   :  { %v424_v39 = vadd.f32 %v423_v38, %v1333_v34 }
 0x2a6   :  { %v429_v40 = vsel %vm242_vm2, %v424_v39, -inf }
 0x2a7   :  { %430 = vmax.xlane.f32.xlu1 %v429_v40 }
 0x2a9   :  { %v334_v41 = vpop.f32.mrf.mxu2 }
 0x2aa   :  { %1036 = vmatmul.msk.f32.gmra.mxu3 %vm110_vm0, %v334_v41 }
 0x2c0   :  { %589 = vrot.lane.b32.xlu1 %v1315_v22, %s1177_s6 }
 0x2cb   :  { %v440_v42 = vpop.xlane.xlu1 %439 }
 0x2cc   :  { %1092 = vrcp.f32 %v440_v42  ;;  %v455_v48 = vand.u32 2147483648, %v440_v42  ;;  %vm449_vm12 = vweird.f32 %v440_v42  ;;  %v453_v49 = vand.u32 2147483647, %v440_v42 }
 0x2ce   :  { %v456_v51 = vor.u32 1.1754944e-38, %v455_v48  ;;  %vm454_vm14 = vcmp.eq.f32.partialorder %v453_v49, 8.507059e+37 }
 0x2d2   :  { %v1093_v43 = vpop.eup %1092 }
 0x2d3   :  { %v445_v44 = vmul.f32 %v1093_v43, %v440_v42  ;;  %vm450_vm11 = vweird.f32 %v1093_v43 }
 0x2d4   :  { %vm451_vm13 = vmor %vm449_vm12, %vm450_vm11 }
 0x2d5   :  { %v446_v45 = vsub.f32 1.0, %v445_v44 }
 0x2d7   :  { %v447_v46 = vmul.f32 %v1093_v43, %v446_v45 }
 0x2d9   :  { %v448_v47 = vadd.f32 %v1093_v43, %v447_v46 }
 0x2db   :  { %v452_v50 = vsel %vm451_vm13, %v1093_v43, %v448_v47 }
 0x2dc   :  { %v457_v52 = vsel %vm454_vm14, %v456_v51, %v452_v50  ;;  %v718_v51 = vld [vmem:[%s1497_s8 + $0x28] sm:$0xff] }
 0x2dd   :  { %v472_v54 = vmul.f32 %v1091_v31, %v457_v52 }
 0x2e3   :  { %v476_v53 = vpop.permute.xlu1 %475 }
 0x2e4   :  { %496 = vmatpush.msrb.mxu2 %v476_v53 }
 0x2e5   :  { %1041 = vmatmul.msk.f32.vlgmr.msrb.gmra.mxu2 %vm242_vm2, %v472_v54 }
 0x2e6   :  { %1045 = vmatpush.xpose.msk.msra.mxu2 %vm110_vm0, %v564_v33 }
 0x2ed   :  { %1046 = vmatmul.msk.f32.vlgmr.msra.gmra.mxu2 %vm110_vm0, %v562_v55 }
 0x31a   :  { %v431_v56 = vpop.xlane.xlu1 %430 }
 0x31b   :  { %v433_v57 = vsub.f32 %v424_v39, %v431_v56 }
 0x31d   :  { %v436_v58 = vmul.f32 1.442695, %v433_v57  ;;  %v717_v57 = vld [vmem:[%s1497_s8 + $0x20] sm:$0xff] }
 0x31f   :  { %1094 = vpow2.f32 %v436_v58  ;;  %v1415_v30 = vpop.f32.mrf.mxu3 }
 0x325   :  { %v1095_v59 = vpop.eup %1094 }
 0x326   :  { %v441_v60 = vsel %vm242_vm2, %v1095_v59, 0.0 }
 0x327   :  { %442 = vadd.xlane.f32.xlu0 %v441_v60 }
 0x32d   :  { %v1417_v32 = vpop.f32.mrf.mxu3 }
 0x33b   :  { %591 = vrot.lane.b32.xlu0 %v1305_v19, %s1177_s6 }
 0x343   :  { %752 = vrot.lane.b32.xlu0 %v1293_v13, %s1178_s22 }
 0x34b   :  { %750 = vrot.lane.b32.xlu0 %v1302_v17, %s1178_s22 }
 0x368   :  { %v498_v1 = vpop.f32.mrf.mxu2 }
 0x369   :  { %1043 = vmatmul.msk.f32.vlgmr.msrb.gmra.mxu1 %vm110_vm0, %v498_v1 }
 0x370   :  { %v586_v2 = vpop.f32.mrf.mxu2 }
 0x371   :  { %v587_v3 = vadd.f32 %v586_v2, %v1326_v27 }
 0x373   :  { %v617_v4 = vsel %vm242_vm2, %v587_v3, -inf }
 0x374   :  { %618 = vmax.xlane.f32.xlu2 %v617_v4 }
 0x38c   :  { %665 = vrot.lane.b32.xlu2 %v1357_v62, %s1177_s6 }
 0x394   :  { %778 = vrot.lane.b32.xlu2 %v1315_v22, %s1178_s22  ;;  %v590_v22 = vpop.permute.xlu1 %589 }
 0x39a   :  { %v443_v13 = vpop.xlane.xlu0 %442 }
 0x39b   :  { %1096 = vrcp.f32 %v443_v13  ;;  %v469_v7 = vand.u32 2147483648, %v443_v13  ;;  %v467_v11 = vand.u32 2147483647, %v443_v13  ;;  %vm463_vm3 = vweird.f32 %v443_v13 }
 0x39d   :  { %v470_v14 = vor.u32 1.1754944e-38, %v469_v7  ;;  %vm468_vm5 = vcmp.eq.f32.partialorder %v467_v11, 8.507059e+37 }
 0x3a1   :  { %v1097_v5 = vpop.eup %1096 }
 0x3a2   :  { %v459_v6 = vmul.f32 %v1097_v5, %v443_v13  ;;  %vm464_vm15 = vweird.f32 %v1097_v5 }
 0x3a3   :  { %vm465_vm4 = vmor %vm463_vm3, %vm464_vm15 }
 0x3a4   :  { %v460_v17 = vsub.f32 1.0, %v459_v6 }
 0x3a6   :  { %v461_v8 = vmul.f32 %v1097_v5, %v460_v17 }
 0x3a8   :  { %v462_v12 = vadd.f32 %v1097_v5, %v461_v8 }
 0x3aa   :  { %v466_v15 = vsel %vm465_vm4, %v1097_v5, %v462_v12 }
 0x3ab   :  { %v471_v16 = vsel %vm468_vm5, %v470_v14, %v466_v15 }
 0x3ac   :  { %v473_v18 = vmul.f32 %v1095_v59, %v471_v16 }
 0x3ad   :  { %v592_v20 = vpop.permute.xlu0 %591 }
 0x3ae   :  { %1042 = vmatmul.msk.f32.vlgmr.msra.gmra.mxu0 %vm242_vm2, %v473_v18  ;;  %1047 = vmatpush.xpose.msk.msrb.mxu3 %vm110_vm0, %v592_v20 }
 0x3b1   :  { %1048 = vmatmul.msk.f32.vlgmr.msrb.gmra.mxu3 %vm110_vm0, %v590_v22 }
 0x3b2   :  { %739 = vmatpush.msra.mxu3 %v718_v51 }
 0x3b4   :  { %740 = vmatpush.msra.mxu3 %v717_v57  ;;  %v907_v57 = vld [vmem:[%s1497_s8 + $0x38] sm:$0xff] }
 0x3b5   :  { %v753_v26 = vpop.permute.xlu0 %752 }
 0x3bd   :  { %v751_v49 = vpop.permute.xlu0 %750 }
 0x3e6   :  { %v1433_v58 = vpop.f32.mrf.mxu1 }
 0x3e7   :  { %v619_v21 = vpop.xlane.xlu2 %618 }
 0x3e8   :  { %v623_v23 = vsub.f32 %v587_v3, %v619_v21 }
 0x3ea   :  { %v625_v24 = vmul.f32 1.442695, %v623_v23 }
 0x3ec   :  { %1098 = vpow2.f32 %v625_v24 }
 0x3ef   :  { %v666_v25 = vpop.permute.xlu2 %665 }
 0x3f0   :  { %686 = vmatpush.msrb.mxu0 %v666_v25 }
 0x3f2   :  { %1053 = vmatpush.xpose.msk.msra.mxu0 %vm110_vm0, %v753_v26  ;;  %v1099_v28 = vpop.eup %1098 }
 0x3f3   :  { %v629_v29 = vsel %vm242_vm2, %v1099_v28, 0.0 }
 0x3f4   :  { %630 = vadd.xlane.f32.xlu1 %v629_v29 }
 0x3f7   :  { %v779_v50 = vpop.permute.xlu2 %778 }
 0x40d   :  { %780 = vrot.lane.b32.xlu1 %v1305_v19, %s1178_s22 }
 0x42b   :  { %v525_v31 = vpop.f32.mrf.mxu0 }
 0x42c   :  { %1044 = vmatmul.msk.f32.gmra.mxu1 %vm110_vm0, %v525_v31 }
 0x434   :  { %v614_v33 = vpop.f32.mrf.mxu3 }
 0x435   :  { %v615_v35 = vadd.f32 %v614_v33, %v1333_v34 }
 0x437   :  { %v620_v36 = vsel %vm242_vm2, %v615_v35, -inf }
 0x438   :  { %621 = vmax.xlane.f32.xlu0 %v620_v36 }
 0x467   :  { %v631_v37 = vpop.xlane.xlu1 %630 }
 0x468   :  { %1100 = vrcp.f32 %v631_v37  ;;  %v646_v41 = vand.u32 2147483648, %v631_v37  ;;  %v644_v42 = vand.u32 2147483647, %v631_v37  ;;  %vm640_vm7 = vweird.f32 %v631_v37 }
 0x46a   :  { %v647_v44 = vor.u32 1.1754944e-38, %v646_v41  ;;  %vm645_vm9 = vcmp.eq.f32.partialorder %v644_v42, 8.507059e+37 }
 0x46e   :  { %v1101_v38 = vpop.eup %1100 }
 0x46f   :  { %v636_v39 = vmul.f32 %v1101_v38, %v631_v37  ;;  %vm641_vm6 = vweird.f32 %v1101_v38 }
 0x470   :  { %vm642_vm8 = vmor %vm640_vm7, %vm641_vm6 }
 0x471   :  { %v637_v40 = vsub.f32 1.0, %v636_v39 }
 0x473   :  { %v638_v19 = vmul.f32 %v1101_v38, %v637_v40 }
 0x475   :  { %v639_v43 = vadd.f32 %v1101_v38, %v638_v19 }
 0x477   :  { %v643_v45 = vsel %vm642_vm8, %v1101_v38, %v639_v43 }
 0x478   :  { %v648_v46 = vsel %vm645_vm9, %v647_v44, %v643_v45 }
 0x479   :  { %v663_v47 = vmul.f32 %v1099_v28, %v648_v46 }
 0x47b   :  { %1049 = vmatmul.msk.f32.vlgmr.msrb.gmra.mxu0 %vm242_vm2, %v663_v47 }
 0x47f   :  { %v781_v48 = vpop.permute.xlu1 %780 }
 0x480   :  { %1055 = vmatpush.xpose.msk.msra.mxu1 %vm110_vm0, %v781_v48 }
 0x483   :  { %1054 = vmatmul.msk.f32.vlgmr.msra.gmra.mxu0 %vm110_vm0, %v751_v49  ;;  %1056 = vmatmul.msk.f32.vlgmr.msra.gmra.mxu1 %vm110_vm0, %v779_v50 }
 0x484   :  { %928 = vmatpush.msrb.mxu1 %v907_v57 }
 0x4a9   :  { %v1435_v59 = vpop.f32.mrf.mxu1 }
 0x4ab   :  { %v622_v52 = vpop.xlane.xlu0 %621 }
 0x4ac   :  { %v624_v53 = vsub.f32 %v615_v35, %v622_v52 }
 0x4ae   :  { %v627_v54 = vmul.f32 1.442695, %v624_v53 }
 0x4b0   :  { %1102 = vpow2.f32 %v627_v54 }
 0x4b6   :  { %v1103_v55 = vpop.eup %1102 }
 0x4b7   :  { %v632_v56 = vsel %vm242_vm2, %v1103_v55, 0.0 }
 0x4b8   :  { %633 = vadd.xlane.f32.xlu0 %v632_v56 }
 0x4f8   :  { %v688_v60 = vpop.f32.mrf.mxu0 }
 0x4f9   :  { %1051 = vmatmul.msk.f32.vlgmr.msra.gmra.mxu3 %vm110_vm0, %v688_v60  ;;  %v906_v60 = vld [vmem:[%s1497_s8 + $0x30] sm:$0xff] }
 0x4fa   :  { %929 = vmatpush.msrb.mxu1 %v906_v60 }
 0x500   :  { %v775_v61 = vpop.f32.mrf.mxu0  ;;  %v803_v0 = vpop.f32.mrf.mxu1 }
 0x501   :  { %v776_v1 = vadd.f32 %v775_v61, %v1326_v27  ;;  %v804_v2 = vadd.f32 %v803_v0, %v1333_v34 }
 0x503   :  { %v806_v3 = vsel %vm242_vm2, %v776_v1, -inf  ;;  %v809_v4 = vsel %vm242_vm2, %v804_v2, -inf }
 0x504   :  { %807 = vmax.xlane.f32.xlu1 %v806_v3  ;;  %810 = vmax.xlane.f32.xlu2 %v809_v4 }
 0x51c   :  { %691 = vrot.lane.b32.xlu2 %v1359_v63, %s1177_s6 }
 0x52b   :  { %v634_v13 = vpop.xlane.xlu0 %633 }
 0x52c   :  { %1104 = vrcp.f32 %v634_v13  ;;  %v660_v27 = vand.u32 2147483648, %v634_v13  ;;  %vm654_vm11 = vweird.f32 %v634_v13  ;;  %v658_v34 = vand.u32 2147483647, %v634_v13 }
 0x52e   :  { %v661_v18 = vor.u32 1.1754944e-38, %v660_v27  ;;  %vm659_vm13 = vcmp.eq.f32.partialorder %v658_v34, 8.507059e+37 }
 0x532   :  { %v1105_v5 = vpop.eup %1104 }
 0x533   :  { %v650_v6 = vmul.f32 %v1105_v5, %v634_v13  ;;  %vm655_vm10 = vweird.f32 %v1105_v5 }
 0x534   :  { %vm656_vm12 = vmor %vm654_vm11, %vm655_vm10 }
 0x535   :  { %v651_v17 = vsub.f32 1.0, %v650_v6 }
 0x537   :  { %v652_v7 = vmul.f32 %v1105_v5, %v651_v17 }
 0x539   :  { %v653_v8 = vadd.f32 %v1105_v5, %v652_v7 }
 0x53b   :  { %v657_v16 = vsel %vm656_vm12, %v1105_v5, %v653_v8 }
 0x53c   :  { %v662_v21 = vsel %vm659_vm13, %v661_v18, %v657_v16 }
 0x53d   :  { %v664_v24 = vmul.f32 %v1103_v55, %v662_v21 }
 0x577   :  { %v811_v11 = vpop.xlane.xlu2 %810  ;;  %v808_v12 = vpop.xlane.xlu1 %807 }
 0x578   :  { %v813_v14 = vsub.f32 %v804_v2, %v811_v11  ;;  %v812_v15 = vsub.f32 %v776_v1, %v808_v12  ;;  %v1079_v1 = vld [vmem:[%s1498_s9] ss:$0 sm:$0xff] }
 0x579   :  { %v188_v2 = vadd.f32 %v1079_v1, %v1274_v9  ;;  %v189_v5 = vadd.f32 %v1079_v1, %v1283_v10 }
 0x57a   :  { %v816_v20 = vmul.f32 1.442695, %v813_v14  ;;  %v814_v22 = vmul.f32 1.442695, %v812_v15 }
 0x57b   :  { %v368_v3 = vadd.f32 %v1415_v30, %v188_v2  ;;  %v369_v8 = vadd.f32 %v1417_v32, %v189_v5 }
 0x57c   :  { %1106 = vpow2.f32 %v816_v20  ;;  %v742_v4 = vpop.f32.mrf.mxu3 }
 0x57d   :  { %1108 = vpow2.f32 %v814_v22  ;;  %v559_v13 = vadd.f32 %v1433_v58, %v368_v3  ;;  %v560_v11 = vadd.f32 %v1435_v59, %v369_v8  ;;  %v1179_v58 = vmov 32.0  }
 0x57f   :  { %v692_v23 = vpop.permute.xlu2 %691  ;;  %v748_v6 = vadd.f32 %v742_v4, %v559_v13 }
 0x580   :  { %712 = vmatpush.msrb.mxu2 %v692_v23 }
 0x581   :  { %1050 = vmatmul.msk.f32.vlgmr.msrb.gmra.mxu2 %vm242_vm2, %v664_v24 }
 0x582   :  { %v1107_v25 = vpop.eup %1106 }
 0x583   :  { %v1109_v26 = vpop.eup %1108  ;;  %v821_v28 = vsel %vm242_vm2, %v1107_v25, 0.0 }
 0x584   :  { %822 = vadd.xlane.f32.xlu0 %v821_v28  ;;  %v818_v29 = vsel %vm242_vm2, %v1109_v26, 0.0 }
 0x585   :  { %819 = vadd.xlane.f32.xlu1 %v818_v29 }
 0x598   :  { %880 = vrot.lane.b32.xlu0 %v1359_v63, %s1178_s22 }
 0x59e   :  { %854 = vrot.lane.b32.xlu1 %v1357_v62, %s1178_s22 }
 0x5f7   :  { %v823_v31 = vpop.xlane.xlu0 %822 }
 0x5f8   :  { %1110 = vrcp.f32 %v823_v31  ;;  %v820_v33 = vpop.xlane.xlu1 %819  ;;  %v849_v40 = vand.u32 2147483648, %v823_v31  ;;  %v847_v42 = vand.u32 2147483647, %v823_v31  ;;  %vm843_vm15 = vweird.f32 %v823_v31 }
 0x5f9   :  { %1112 = vrcp.f32 %v820_v33  ;;  %v835_v47 = vand.u32 2147483648, %v820_v33  ;;  %vm829_vm6 = vweird.f32 %v820_v33  ;;  %v833_v49 = vand.u32 2147483647, %v820_v33 }
 0x5fa   :  { %v850_v62 = vor.u32 1.1754944e-38, %v849_v40  ;;  %vm848_vm5 = vcmp.eq.f32.partialorder %v847_v42, 8.507059e+37  ;;  %1114 = vrcp.f32 %v1179_v58 }
 0x5fb   :  { %v836_v53 = vor.u32 1.1754944e-38, %v835_v47  ;;  %vm834_vm8 = vcmp.eq.f32.partialorder %v833_v49, 8.507059e+37  ;;  %v1081_v49 = vld [vmem:[%s1500_s11] ss:$0 sm:$0xff] }
 0x5fe   :  { %v1111_v35 = vpop.eup %1110 }
 0x5ff   :  { %v1113_v36 = vpop.eup %1112  ;;  %v839_v37 = vmul.f32 %v1111_v35, %v823_v31  ;;  %vm844_vm14 = vweird.f32 %v1111_v35 }
 0x600   :  { %v825_v38 = vmul.f32 %v1113_v36, %v820_v33  ;;  %vm845_vm3 = vmor %vm843_vm15, %vm844_vm14  ;;  %vm830_vm4 = vweird.f32 %v1113_v36  ;;  %v1115_v10 = vpop.eup %1114 }
 0x601   :  { %v840_v39 = vsub.f32 1.0, %v839_v37  ;;  %vm831_vm7 = vmor %vm829_vm6, %vm830_vm4  ;;  %v946_v15 = vmul.f32 32.0, %v1115_v10 }
 0x602   :  { %v826_v41 = vsub.f32 1.0, %v825_v38 }
 0x603   :  { %v841_v19 = vmul.f32 %v1111_v35, %v840_v39  ;;  %v947_v16 = vsub.f32 1.0, %v946_v15 }
 0x604   :  { %v827_v43 = vmul.f32 %v1113_v36, %v826_v41  ;;  %v714_v44 = vpop.f32.mrf.mxu2 }
 0x605   :  { %v842_v63 = vadd.f32 %v1111_v35, %v841_v19  ;;  %1052 = vmatmul.msk.f32.gmra.mxu3 %vm110_vm0, %v714_v44  ;;  %v948_v18 = vmul.f32 %v1115_v10, %v947_v16 }
 0x606   :  { %v828_v45 = vadd.f32 %v1113_v36, %v827_v43 }
 0x607   :  { %v846_v46 = vsel %vm845_vm3, %v1111_v35, %v842_v63  ;;  %v949_v20 = vadd.f32 %v1115_v10, %v948_v18 }
 0x608   :  { %v851_v48 = vsel %vm848_vm5, %v850_v62, %v846_v46  ;;  %v832_v51 = vsel %vm831_vm7, %v1113_v36, %v828_v45  ;;  %v1080_v45 = vld [vmem:[%s1499_s10] ss:$0 sm:$0xff]  ;;  %s1180_s10 = smov [#allocation5]  }
 0x609   :  { %v853_v50 = vmul.f32 %v1107_v25, %v851_v48  ;;  %v837_v54 = vsel %vm834_vm8, %v836_v53, %v832_v51  ;;  %s1008_s15 = sshll.u32 %s1180_s10, 4  ;;  %s1009_s15 = int_to_ptr.vmem [resolvable:$true] %s1008_s15 }
 0x60a   :  { %v881_v52 = vpop.permute.xlu0 %880  ;;  %v852_v56 = vmul.f32 %v1109_v26, %v837_v54 }
 0x60b   :  { %901 = vmatpush.msrb.mxu0 %v881_v52 }
 0x60c   :  { %1058 = vmatmul.msk.f32.vlgmr.msrb.gmra.mxu0 %vm242_vm2, %v853_v50 }
 0x610   :  { %v855_v55 = vpop.permute.xlu1 %854 }
 0x611   :  { %875 = vmatpush.msra.mxu2 %v855_v55 }
 0x612   :  { %1057 = vmatmul.msk.f32.vlgmr.msra.gmra.mxu2 %vm242_vm2, %v852_v56 }
 0x688   :  { %v745_v34 = vpop.f32.mrf.mxu3 }
 0x689   :  { %v903_v0 = vpop.f32.mrf.mxu0  ;;  %v749_v12 = vadd.f32 %v745_v34, %v560_v11 }
 0x695   :  { %v877_v61 = vpop.f32.mrf.mxu2 }
 0x696   :  { %1059 = vmatmul.msk.f32.vlgmr.msrb.gmra.mxu1 %vm110_vm0, %v877_v61 }
 0x69e   :  { %1060 = vmatmul.msk.f32.gmra.mxu1 %vm110_vm0, %v903_v0  ;;  %vm950_vm0 = vweird.f32 %v1115_v10 }
 0x69f   :  { %v951_v32 = vsel %vm950_vm0, %v1115_v10, %v949_v20 }
 0x713   :  { %v931_v17 = vpop.f32.mrf.mxu1 }
 0x714   :  { %v937_v7 = vadd.f32 %v931_v17, %v748_v6 }
 0x716   :  { %v939_v27 = vsel %vm72_vm1, %v937_v7, 0.0 }
 0x717   :  { %940 = vadd.xlane.f32.xlu2 %v939_v27 }
 0x71b   :  { %v934_v9 = vpop.f32.mrf.mxu1 }
 0x71c   :  { %v938_v14 = vadd.f32 %v934_v9, %v749_v12 }
 0x71e   :  { %v942_v30 = vsel %vm72_vm1, %v938_v14, 0.0 }
 0x71f   :  { %943 = vadd.xlane.f32.xlu1 %v942_v30 }
 0x78a   :  { %v941_v22 = vpop.xlane.xlu2 %940 }
 0x78b   :  { %v952_v21 = vmul.f32 %v951_v32, %v941_v22 }
 0x78d   :  { %v954_v23 = vsub.f32 %v937_v7, %v952_v21 }
 0x78f   :  { %v956_v24 = vmul.f32 %v954_v23, %v954_v23 }
 0x791   :  { %v958_v59 = vsel %vm72_vm1, %v956_v24, 0.0 }
 0x792   :  { %959 = vadd.xlane.f32.xlu0 %v958_v59  ;;  %v944_v25 = vpop.xlane.xlu1 %943 }
 0x793   :  { %v953_v26 = vmul.f32 %v951_v32, %v944_v25 }
 0x795   :  { %v955_v28 = vsub.f32 %v938_v14, %v953_v26 }
 0x797   :  { %v957_v29 = vmul.f32 %v955_v28, %v955_v28 }
 0x799   :  { %v961_v31 = vsel %vm72_vm1, %v957_v29, 0.0 }
 0x79a   :  { %962 = vadd.xlane.f32.xlu2 %v961_v31 }
 0x805   :  { %v960_v33 = vpop.xlane.xlu0 %959 }
 0x806   :  { %v964_v35 = vmul.f32 %v960_v33, %v951_v32 }
 0x808   :  { %v966_v36 = vadd.f32 1e-05, %v964_v35 }
 0x80a   :  { %1116 = vrsqrt.f32 %v966_v36  ;;  %vm974_vm9 = vweird.f32 %v966_v36 }
 0x80d   :  { %v963_v37 = vpop.xlane.xlu2 %962 }
 0x80e   :  { %v965_v38 = vmul.f32 %v963_v37, %v951_v32 }
 0x810   :  { %v1117_v39 = vpop.eup %1116  ;;  %v967_v40 = vadd.f32 1e-05, %v965_v38 }
 0x811   :  { %v969_v41 = vmul.f32 %v1117_v39, %v966_v36  ;;  %vm975_vm2 = vweird.f32 %v1117_v39 }
 0x812   :  { %1118 = vrsqrt.f32 %v967_v40  ;;  %vm976_vm10 = vmor %vm974_vm9, %vm975_vm2  ;;  %vm984_vm12 = vweird.f32 %v967_v40 }
 0x813   :  { %v970_v19 = vmul.f32 %v1117_v39, %v969_v41 }
 0x815   :  { %v971_v42 = vmul.f32 0.5, %v970_v19 }
 0x817   :  { %v972_v43 = vsub.f32 1.5, %v971_v42 }
 0x818   :  { %v1119_v44 = vpop.eup %1118 }
 0x819   :  { %v973_v63 = vmul.f32 %v1117_v39, %v972_v43  ;;  %v979_v62 = vmul.f32 %v1119_v44, %v967_v40  ;;  %vm985_vm11 = vweird.f32 %v1119_v44 }
 0x81a   :  { %vm986_vm13 = vmor %vm984_vm12, %vm985_vm11 }
 0x81b   :  { %v977_v46 = vsel %vm976_vm10, %v1117_v39, %v973_v63  ;;  %v980_v47 = vmul.f32 %v1119_v44, %v979_v62 }
 0x81c   :  { %v988_v48 = vmul.f32 %v977_v46, %v954_v23 }
 0x81d   :  { %v981_v50 = vmul.f32 0.5, %v980_v47 }
 0x81e   :  { %v994_v51 = vmul.f32 %v1080_v45, %v988_v48 }
 0x81f   :  { %v982_v52 = vsub.f32 1.5, %v981_v50 }
 0x820   :  { %v1000_v53 = vadd.f32 %v1081_v49, %v994_v51 }
 0x821   :  { %v983_v54 = vmul.f32 %v1119_v44, %v982_v52 }
 0x822   :  { %1002 = vst.msk [vmem:[#allocation5] sm:$0xff] %vm72_vm1, %v1000_v53 }
 0x823   :  { %v987_v55 = vsel %vm986_vm13, %v1119_v44, %v983_v54 }
 0x824   :  { %v989_v56 = vmul.f32 %v987_v55, %v955_v28 }
 0x826   :  { %v995_v57 = vmul.f32 %v1080_v45, %v989_v56 }
 0x828   :  { %v1001_v60 = vadd.f32 %v1081_v49, %v995_v57 }
 0x82a   :  { %1003 = vst.msk [vmem:[#allocation5 + $0x8] sm:$0xff] %vm72_vm1, %v1001_v60 }
 0x82b   :  { %1016 = dma.vmem_to_hbm [thread:$0]  %s1009_s15, 256, %s1011_s2, [#allocation4], %s1173_s26, %s1173_s26, %s1174_s27  }
 0x82c   :  { %1170 = dma.done.wait [#allocation4], 256  }
 0x82d   :  { %1171 = vsyncadd [#allocation4], 4294967040 }
 0x82e   :  { %1021 = vsyncpa [#allocation3], 1 }
 0x82f   :  { %1022 = vsyncpa [#allocation4], 1 }

</bundles_post_ra>
